<compile_context>
chip_gen: v6e
topology: v6e:2x2x1
jax: 0.10.0
libtpu: 0.0.40
codegen_flags: <defaults>
</compile_context>

<pallas_src>
import jax
import jax.numpy as jnp
import numpy as np
from jax import lax
from jax.experimental import pallas as pl
from jax.experimental.pallas import tpu as pltpu

NUM_CLASSES = 5
_LANE = 128


def _round_up(n, m):
    return (n + m - 1) // m * m


def _vmem_limit_bytes():
    # Generation-aware budget: ~48 MiB on v7x (64 MiB physical VMEM per TC),
    # ~96 MiB on v5e/v6e (128 MiB physical). Falls back to the v7x value.
    cap = 64 * 1024 * 1024
    try:
        info_cap = int(pltpu.get_tpu_info().vmem_capacity_bytes)
        if info_cap > 0:
            cap = info_cap
    except Exception:
        pass
    return int(min(max(cap * 3 // 4, 16 * 1024 * 1024), 96 * 1024 * 1024))


def _choose_tile_b(B, D, x_itemsize, n_narrow_blocks, vmem_limit, row_align):
    """Pick the batch tile by VMEM bytes (double-buffered), not a fixed row cap."""
    d_pad = _round_up(max(D, 1), _LANE)
    # Per batch-row VMEM: double-buffered x tile + double-buffered lane-padded
    # narrow (<128-wide) blocks (probs / NLL / labels, 4 B elements).
    per_row = 2 * (d_pad * x_itemsize + n_narrow_blocks * _LANE * 4)
    budget = int(vmem_limit * 0.8)              # headroom for weight/bias/scratch
    rows = max(row_align, budget // per_row)
    rows = min(rows, 128 * 1024)                # already plenty to amortize overhead
    rows = min(rows, _round_up(B, row_align))
    rows = max(row_align, (rows // row_align) * row_align)
    return rows


def _predict_kernel(x_ref, wt_ref, b_ref, out_ref):
    # logits = x @ W^T + b   (MXU matmul, f32 accumulate)
    logits = jnp.dot(x_ref[...], wt_ref[...], preferred_element_type=jnp.float32)
    logits = logits + b_ref[...]
    # softmax along dim=1 (classes)
    m = jnp.max(logits, axis=1, keepdims=True)
    e = jnp.exp(logits - m)
    out_ref[...] = (e / jnp.sum(e, axis=1, keepdims=True)).astype(out_ref.dtype)


def _loss_kernel(x_ref, wt_ref, b_ref, y_ref, nll_ref):
    logits = jnp.dot(x_ref[...], wt_ref[...], preferred_element_type=jnp.float32)
    logits = logits + b_ref[...]
    # nn.Softmax(dim=1)
    m = jnp.max(logits, axis=1, keepdims=True)
    e = jnp.exp(logits - m)
    y_pred = e / jnp.sum(e, axis=1, keepdims=True)

    # nn.CrossEntropyLoss applied to the already-softmaxed probabilities
    # (faithful to the PyTorch module): log_softmax(y_pred) picked at the label.
    # The mean reduction happens in plain JAX so the grid axis stays "parallel".
    m2 = jnp.max(y_pred, axis=1, keepdims=True)
    lse = m2 + jnp.log(jnp.sum(jnp.exp(y_pred - m2), axis=1, keepdims=True))
    logp = y_pred - lse                                      # (tile_b, C)

    cls = lax.broadcasted_iota(jnp.int32, logp.shape, 1)     # (tile_b, C)
    onehot = cls == y_ref[...]                               # broadcast of (tile_b, 1)
    picked = jnp.sum(jnp.where(onehot, logp, 0.0), axis=1, keepdims=True)

    # Ragged last tile: rows past B are never stored (Pallas masks OOB writes),
    # so no garbage leaks into the wrapper-side mean.
    nll_ref[...] = -picked


def torch_model_forward(x, weight, bias, y=None, *, tile_b=None):
    """Mirrors TorchModel.forward(x, y=None)."""
    B, D = x.shape

    # Don't upcast bf16 inputs: the kernel is HBM-read bound on x and the MXU
    # takes bf16 natively; accumulation / softmax math is f32 regardless.
    compute_dtype = jnp.bfloat16 if x.dtype == jnp.bfloat16 else jnp.float32
    itemsize = jnp.dtype(compute_dtype).itemsize
    row_align = 16 if compute_dtype == jnp.bfloat16 else 8

    x = x.astype(compute_dtype)
    wt = weight.T.astype(compute_dtype)                  # (D, 5)
    b2 = bias.reshape(1, NUM_CLASSES).astype(jnp.float32)

    vmem_limit = _vmem_limit_bytes()
    n_narrow = 1 if y is None else 2                     # probs | nll + labels
    if tile_b is None:
        tile_b = _choose_tile_b(B, D, itemsize, n_narrow, vmem_limit, row_align)
    tile_b = max(row_align, (tile_b // row_align) * row_align)

    # No jnp.pad of x: ragged last tile handled by Pallas edge-block masking.
    grid = pl.cdiv(B, tile_b)

    x_spec = pl.BlockSpec((tile_b, D), lambda i: (i, 0))
    # Weight / bias: constant index maps -> DMA'd once, resident across tiles.
    wt_spec = pl.BlockSpec((D, NUM_CLASSES), lambda i: (0, 0))
    b_spec = pl.BlockSpec((1, NUM_CLASSES), lambda i: (0, 0))

    compiler_params = pltpu.CompilerParams(
        dimension_semantics=("parallel",),
        vmem_limit_bytes=vmem_limit,
    )

    w_bytes = D * NUM_CLASSES * itemsize + NUM_CLASSES * 4
    matmul_flops = 2 * B * D * NUM_CLASSES

    if y is None:
        cost = pl.CostEstimate(
            flops=matmul_flops + 4 * B * NUM_CLASSES,
            transcendentals=B * NUM_CLASSES,
            bytes_accessed=B * D * itemsize + w_bytes + B * NUM_CLASSES * 4,
        )
        out = pl.pallas_call(
            _predict_kernel,
            grid=(grid,),
            in_specs=[x_spec, wt_spec, b_spec],
            out_specs=pl.BlockSpec((tile_b, NUM_CLASSES), lambda i: (i, 0)),
            out_shape=jax.ShapeDtypeStruct((B, NUM_CLASSES), jnp.float32),
            compiler_params=compiler_params,
            cost_estimate=cost,
        )(x, wt, b2)
        # TODO(synk): a lane-dense (5, B) transposed output would save the masked
        # vst's ~10% write overhead, but the wrapper-side transpose back to (B, 5)
        # costs more HBM traffic than it saves for this output size.
        return out

    y2 = y.astype(jnp.int32).reshape(B, 1)
    cost = pl.CostEstimate(
        flops=matmul_flops + 10 * B * NUM_CLASSES,
        transcendentals=2 * B * NUM_CLASSES + B,
        bytes_accessed=B * D * itemsize + w_bytes + B * 4 + B * 4,
    )
    nll = pl.pallas_call(
        _loss_kernel,
        grid=(grid,),
        in_specs=[x_spec, wt_spec, b_spec,
                  pl.BlockSpec((tile_b, 1), lambda i: (i, 0))],
        out_specs=pl.BlockSpec((tile_b, 1), lambda i: (i, 0)),
        out_shape=jax.ShapeDtypeStruct((B, 1), jnp.float32),
        compiler_params=compiler_params,
        cost_estimate=cost,
    )(x, wt, b2, y2)
    # Final mean over B scalars in plain JAX: keeps the grid axis "parallel"
    # (megacore on v7x) and only touches 4*B extra HBM bytes.
    return jnp.mean(nll)


def _reference_forward(x, weight, bias, y=None):
    logits = x.astype(jnp.float32) @ weight.T.astype(jnp.float32) + bias
    y_pred = jax.nn.softmax(logits, axis=1)
    if y is None:
        return y_pred
    logp = jax.nn.log_softmax(y_pred, axis=1)
    return -jnp.mean(logp[jnp.arange(x.shape[0]), y])


if __name__ == "__main__":
    key = jax.random.PRNGKey(0)
    D = 32
    kx, kw, kb, ky = jax.random.split(key, 4)

    # deterministic nn.Linear-style init: U(-1/sqrt(in), 1/sqrt(in))
    bound = 1.0 / (D ** 0.5)
    weight = jax.random.uniform(kw, (NUM_CLASSES, D), minval=-bound, maxval=bound,
                                dtype=jnp.float32)
    bias = jax.random.uniform(kb, (NUM_CLASSES,), minval=-bound, maxval=bound,
                              dtype=jnp.float32)

    # --- case 1: single tile (B=8), auto tile size ---------------------------
    B = 8
    x = jax.random.normal(kx, (B, D), dtype=jnp.float32)
    y = jax.random.randint(ky, (B,), 0, NUM_CLASSES)

    y_pred = torch_model_forward(x, weight, bias)          # inference path
    loss = torch_model_forward(x, weight, bias, y)         # training path
    jax.block_until_ready((y_pred, loss))

    np.testing.assert_allclose(np.asarray(y_pred),
                               np.asarray(_reference_forward(x, weight, bias)),
                               rtol=1e-5, atol=1e-5)
    np.testing.assert_allclose(np.asarray(loss),
                               np.asarray(_reference_forward(x, weight, bias, y)),
                               rtol=1e-5, atol=1e-5)

    # --- case 2: multi-tile + ragged last tile, NO padding (B=20, tile_b=8) ---
    B2 = 20
    x2 = jax.random.normal(kx, (B2, D), dtype=jnp.float32)
    y2 = jax.random.randint(ky, (B2,), 0, NUM_CLASSES)

    y_pred2 = torch_model_forward(x2, weight, bias, tile_b=8)
    loss2 = torch_model_forward(x2, weight, bias, y2, tile_b=8)
    jax.block_until_ready((y_pred2, loss2))

    np.testing.assert_allclose(np.asarray(y_pred2),
                               np.asarray(_reference_forward(x2, weight, bias)),
                               rtol=1e-5, atol=1e-5)
    np.testing.assert_allclose(np.asarray(loss2),
                               np.asarray(_reference_forward(x2, weight, bias, y2)),
                               rtol=1e-5, atol=1e-5)

    print("KERNEL_OK")
</pallas_src>

<mosaic_0001>
module attributes {stable_mosaic.version = 11 : i64} {
  func.func @_predict_kernel(%arg0: i32, %arg1: memref<8x32xf32, #tpu.memory_space<vmem>>, %arg2: memref<32x5xf32, #tpu.memory_space<vmem>>, %arg3: memref<1x5xf32, #tpu.memory_space<vmem>>, %arg4: memref<8x5xf32, #tpu.memory_space<vmem>>) attributes {dimension_semantics = [#tpu.dimension_semantics<parallel>], iteration_bounds = array<i64: 1>, scalar_prefetch = 0 : i64, scratch_operands = 0 : i64, tpu.core_type = #tpu.core_type<tc>, window_params = [{transform_indices = @transform_0, window_bounds = array<i64: 8, 32>}, {pipeline_mode = #tpu.pipeline_mode<synchronous>, transform_indices = @transform_1, window_bounds = array<i64: 32, 5>}, {pipeline_mode = #tpu.pipeline_mode<synchronous>, transform_indices = @transform_2, window_bounds = array<i64: 1, 5>}, {transform_indices = @transform_3, window_bounds = array<i64: 8, 5>}]} {
    %c0 = arith.constant 0 : index
    %c0_0 = arith.constant 0 : index
    %0 = vector.load %arg1[%c0, %c0_0] : memref<8x32xf32, #tpu.memory_space<vmem>>, vector<8x32xf32>
    %c0_1 = arith.constant 0 : index
    %c0_2 = arith.constant 0 : index
    %1 = vector.load %arg2[%c0_1, %c0_2] : memref<32x5xf32, #tpu.memory_space<vmem>>, vector<32x5xf32>
    %cst = arith.constant dense<0.000000e+00> : vector<8x5xf32>
    %2 = tpu.matmul %0, %1, %cst {dimension_numbers = #tpu.dot_dimension_numbers<[1], [0], [0], [1], [0, 0, 1, 1], [], []>} : vector<8x32xf32>, vector<32x5xf32>, vector<8x5xf32> -> vector<8x5xf32>
    %c0_3 = arith.constant 0 : index
    %c0_4 = arith.constant 0 : index
    %3 = vector.load %arg3[%c0_3, %c0_4] : memref<1x5xf32, #tpu.memory_space<vmem>>, vector<1x5xf32>
    %4 = vector.broadcast %3 : vector<1x5xf32> to vector<8x5xf32>
    %5 = arith.addf %2, %4 : vector<8x5xf32>
    %cst_5 = arith.constant dense<0xFF800000> : vector<8xf32>
    %6 = vector.multi_reduction <maximumf>, %5, %cst_5 [1] : vector<8x5xf32> to vector<8xf32>
    %7 = vector.shape_cast %6 : vector<8xf32> to vector<8x1xf32>
    %8 = vector.broadcast %7 : vector<8x1xf32> to vector<8x5xf32>
    %9 = arith.subf %5, %8 : vector<8x5xf32>
    %10 = math.exp %9 : vector<8x5xf32>
    %cst_6 = arith.constant dense<0.000000e+00> : vector<8xf32>
    %11 = vector.multi_reduction <add>, %10, %cst_6 [1] : vector<8x5xf32> to vector<8xf32>
    %12 = vector.shape_cast %11 : vector<8xf32> to vector<8x1xf32>
    %13 = vector.broadcast %12 : vector<8x1xf32> to vector<8x5xf32>
    %14 = arith.divf %10, %13 : vector<8x5xf32>
    %c0_7 = arith.constant 0 : index
    %c0_8 = arith.constant 0 : index
    %15 = vector.load %arg4[%c0_7, %c0_8] : memref<8x5xf32, #tpu.memory_space<vmem>>, vector<8x5xf32>
    tpu.vector_store %arg4[%c0_7, %c0_8], %14 {strides = array<i32>} : memref<8x5xf32, #tpu.memory_space<vmem>>, vector<8x5xf32>,
    return
  }
  func.func @transform_0(%arg0: i32) -> (i32, i32) {
    %c0_i32 = arith.constant 0 : i32
    %c0_i32_0 = arith.constant 0 : i32
    return %arg0, %c0_i32 : i32, i32
  }
  func.func @transform_1(%arg0: i32) -> (i32, i32) {
    %c0_i32 = arith.constant 0 : i32
    %c0_i32_0 = arith.constant 0 : i32
    %c0_i32_1 = arith.constant 0 : i32
    return %c0_i32, %c0_i32_0 : i32, i32
  }
  func.func @transform_2(%arg0: i32) -> (i32, i32) {
    %c0_i32 = arith.constant 0 : i32
    %c0_i32_0 = arith.constant 0 : i32
    %c0_i32_1 = arith.constant 0 : i32
    return %c0_i32, %c0_i32_0 : i32, i32
  }
  func.func @transform_3(%arg0: i32) -> (i32, i32) {
    %c0_i32 = arith.constant 0 : i32
    %c0_i32_0 = arith.constant 0 : i32
    return %arg0, %c0_i32 : i32, i32
  }
}

</mosaic_0001>

<bundles_post_ra>
// kernel: tpu_custom_call.1
= control target key start
LH: loop header
LB: loop body
LE: loop exit
PB: predicated region body
PF: predicated region fallthrough
CT: control target
= control target key end

     0   :  { %v175_v1 = vmov 0.0   ;;  %vm176_vm0 = vmmov 0   ;;  %s222_s0 = inlined_call_operand.vmem [shape: f32[8,32], index: 0, kind: input, shape index: {}]   ;;  %s223_s1 = inlined_call_operand.vmem [shape: f32[32,5], index: 1, kind: input, shape index: {}]   ;;  %s224_s2 = inlined_call_operand.vmem [shape: f32[1,5], index: 2, kind: input, shape index: {}]   ;;  %s225_s3 = inlined_call_operand.hbm [shape: f32[8,5], index: 3, kind: output, shape index: {}]  }
   0x1   :  { %v19_v0 = vld [vmem:[%s223_s1 + $0x18] sm:$0xff]  ;;  %135 = vmatprep.subr.mxu0 %v175_v1  ;;  %v18_v2 = vld [vmem:[%s223_s1 + $0x10] sm:$0xff]  ;;  %143 = vmatprep.mubr.msk.f32.mxu0 %vm176_vm0, %v175_v1 }
   0x2   :  { %136 = vmatpush3.msra.mxu0 %v19_v0 }
   0x3   :  { %8 = vsyncpa [#allocation3], 0  ;;  %137 = vmatprep.subr.mxu0 %v175_v1  ;;  %v17_v3 = vld [vmem:[%s223_s1 + $0x8] sm:$0xff]  ;;  %v16_v4 = vld [vmem:[%s223_s1] sm:$0xff]  ;;  %vm27_vm1 = vcmask 261120   ;;  %vm101_vm2 = vcmask 39936  }
   0x4   :  { %138 = vmatpush3.msra.mxu0 %v18_v2  ;;  %v15_v5 = vld [vmem:[%s222_s0] sm:$0xff]  ;;  %s177_s0 = smov [#allocation2]  }
   0x5   :  { %139 = vmatprep.subr.mxu0 %v175_v1  ;;  %v128_v6 = vld [vmem:[%s224_s2] ss:$0 sm:$0xff]  ;;  %s120_s1 = sshll.u32 %s177_s0, 4  ;;  %s121_s1 = int_to_ptr.vmem [resolvable:$true] %s120_s1 }
   0x6   :  { %140 = vmatpush3.msra.mxu0 %v17_v3  ;;  %s153_s2 = scalar_lea.vmem %s121_s1, 128  ;;  %p158_p1 = scmp.lt.s32.totalorder %s121_s1, %s121_s1 }
   0x7   :  { %141 = vmatprep.subr.mxu0 %v175_v1  ;;  %p154_p0 = scmp.ne.s32.totalorder %s121_s1, %s153_s2  ;;  %p159_p2 = scmp.lt.s32.totalorder %s153_s2, %s153_s2 }
   0x8   :  { %142 = vmatpush3.msra.mxu0 %v16_v4 }
   0x9   :  { %144 = vmatmul.mubr.msk.f32.vlgmr.msra.gmra.mxu0 %vm27_vm1, %v15_v5  ;;  %p160_p3 = por %p159_p2, %p158_p1 }
   0xb   :  { %p161_p4 = pnand %p160_p3, %p154_p0 }
  0xc9   :  { %v97_v7 = vpop.f32.mrf.mxu0 }
  0xca   :  { %v98_v8 = vadd.f32 %v128_v6, %v97_v7 }
  0xcb   :  { %v145_v9 = vpop.f32.mrf.mxu0 }
  0xcc   :  { %v102_v10 = vsel %vm101_vm2, %v98_v8, -inf }
  0xcd   :  { %103 = vmax.xlane.f32.xlu0 %v102_v10 }
 0x156   :  { %v104_v11 = vpop.xlane.xlu0 %103 }
 0x157   :  { %v105_v12 = vsub.f32 %v98_v8, %v104_v11 }
 0x159   :  { %v106_v13 = vmul.f32 1.442695, %v105_v12 }
 0x15b   :  { %149 = vpow2.f32 %v106_v13 }
 0x168   :  { %v150_v14 = vpop.eup %149 }
 0x169   :  { %v108_v15 = vsel %vm101_vm2, %v150_v14, 0.0 }
 0x16a   :  { %109 = vadd.xlane.f32.xlu0 %v108_v15 }
 0x1f3   :  { %v110_v16 = vpop.xlane.xlu0 %109 }
 0x1f4   :  { %151 = vrcp.f32 %v110_v16 }
 0x201   :  { %v152_v17 = vpop.eup %151 }
 0x202   :  { %v112_v18 = vmul.f32 %v152_v17, %v150_v14 }
 0x204   :  { %113 = vst.msk [vmem:[#allocation2] sm:$0xff] %vm101_vm2, %v112_v18 }
 0x205   :  { %164 = shalt.err (!%p161_p4)
}
 0x206   :  { %123 = dma.vmem_to_hbm [thread:$0]  %s121_s1, 128, %s225_s3, [#allocation3]  }
 0x207   :  { %173 = dma.done.wait [#allocation3], 128  }
 0x208   :  { %174 = vsyncadd [#allocation3], 4294967168 }
 0x209   :  { %127 = vsyncpa [#allocation3], 1 }

</bundles_post_ra>
